<compile_context>
chip_gen: v5e
topology: v5e:2x2
jax: 0.10.0
libtpu: 0.0.40
codegen_flags: <defaults>
</compile_context>

<pallas_src>
import functools
import math

import jax
import jax.numpy as jnp
from jax.experimental import pallas as pl
from jax.experimental.pallas import tpu as pltpu

_HALF_PI = math.pi / 2.0


def _choose_row_tile(n_rows: int, row_bytes: int, target_bytes: int = 4 << 20) -> int:
    """Byte-based row tile (~4 MiB/block), multiple of 8, and >= 2 grid steps when
    the array is big enough (v7x has 2 TensorCores sharing the 'parallel' axis)."""
    if n_rows <= 8:
        return n_rows                               # single block == full array
    t = min(n_rows, max(8, target_bytes // row_bytes))
    t = max(8, (t // 8) * 8)
    if n_rows >= 16 and t >= n_rows:                # guarantee >= 2 grid steps
        t = max(8, (((n_rows + 1) // 2) // 8) * 8)
    return t


def _pe_kernel(consts_ref, out_ref):
    """out[r, c] = sin(global_row(r) * consts[0, c] + consts[1, c]).

    consts_ref: (2, W) f32, VMEM-resident across the whole grid.
    out_ref:    (TS, W) row tile of the output (or of its lane-dense flat view).
    """
    TS = out_ref.shape[0]
    row0 = pl.program_id(0) * TS
    r = (row0 + jax.lax.broadcasted_iota(jnp.int32, (TS, 1), 0)).astype(jnp.float32)
    scale = consts_ref[0:1, :]      # (1, W)
    offset = consts_ref[1:2, :]     # (1, W)
    out_ref[...] = jnp.sin(r * scale + offset).astype(out_ref.dtype)


def _column_constants(d_model: int):
    """inv_denom[c] = 10000^(-2*(c//2)/D), phase[c] = pi/2 on odd columns."""
    col = jnp.arange(d_model, dtype=jnp.int32)
    k = (col // 2).astype(jnp.float32)
    inv_denom = 1.0 / jnp.power(jnp.float32(10000.0), (2.0 * k) / jnp.float32(d_model))
    phase = jnp.where(col % 2 == 1, jnp.float32(_HALF_PI), jnp.float32(0.0))
    return inv_denom, phase


def positional_encoding(d_model: int, max_sequence_length: int,
                        dtype=jnp.float32) -> jax.Array:
    """PE table of shape (max_sequence_length, d_model).

    dtype defaults to float32 (matches the PyTorch module); pass jnp.bfloat16 to
    halve HBM store bytes if the consumer adds PE to bf16 activations.
    """
    assert d_model % 2 == 0, "interleaved sin/cos PE requires even d_model"
    S, D = max_sequence_length, d_model
    total = S * D
    inv_denom, phase = _column_constants(D)

    # --- Path A: small D -> lane-dense flat (total/W, W) view, widest W possible.
    if D < 128:
        for W in (512, 256, 128):
            if W % D == 0 and total % W == 0:
                n_rows = total // W
                per_row = W // D
                lane = jnp.arange(W, dtype=jnp.int32)
                colw = lane % D
                inv_w = inv_denom[colw]
                # pos = flat_row*per_row + lane//D ; angle = pos*inv_denom + phase
                scale = jnp.float32(per_row) * inv_w
                offset = (lane // D).astype(jnp.float32) * inv_w + phase[colw]
                consts = jnp.stack([scale, offset], axis=0)          # (2, W)
                ts = _choose_row_tile(n_rows, W * 4)
                flat = pl.pallas_call(
                    _pe_kernel,
                    out_shape=jax.ShapeDtypeStruct((n_rows, W), dtype),
                    grid=(pl.cdiv(n_rows, ts),),
                    in_specs=[pl.BlockSpec((2, W), lambda i: (0, 0))],
                    out_specs=pl.BlockSpec((ts, W), lambda i: (i, 0)),
                    compiler_params=pltpu.CompilerParams(
                        dimension_semantics=("parallel",)),
                )(consts)
                return flat.reshape(S, D)   # free row-major reshape of flat view

    # --- Path B/C: row-tiled (S, D); block last dim = full D is valid even when
    # D % 128 != 0 (only the second-to-last dim must be a multiple of 8).
    consts = jnp.stack([inv_denom, phase], axis=0)                   # (2, D)
    ts = _choose_row_tile(S, D * 4)
    return pl.pallas_call(
        _pe_kernel,
        out_shape=jax.ShapeDtypeStruct((S, D), dtype),
        grid=(pl.cdiv(S, ts),),
        in_specs=[pl.BlockSpec((2, D), lambda i: (0, 0))],
        out_specs=pl.BlockSpec((ts, D), lambda i: (i, 0)),
        compiler_params=pltpu.CompilerParams(
            dimension_semantics=("parallel",)),
    )(consts)


@functools.lru_cache(maxsize=None)
def positional_encoding_cached(d_model: int, max_sequence_length: int) -> jax.Array:
    """PE is input-independent: build it once (model init) and reuse it.
    This is the single largest end-to-end win vs. re-launching per forward()."""
    return jax.block_until_ready(positional_encoding(d_model, max_sequence_length))


def _reference_pe(d_model: int, max_sequence_length: int) -> jax.Array:
    even_i = jnp.arange(0, d_model, 2, dtype=jnp.float32)
    denominator = jnp.power(10000.0, even_i / d_model)
    position = jnp.arange(max_sequence_length, dtype=jnp.float32).reshape(
        max_sequence_length, 1)
    even_pe = jnp.sin(position / denominator)
    odd_pe = jnp.cos(position / denominator)
    stacked = jnp.stack([even_pe, odd_pe], axis=2)
    return stacked.reshape(max_sequence_length, d_model)


if __name__ == "__main__":
    # Module has no tensor inputs; forward() depends only on the two __init__ ints.
    _ = jax.random.PRNGKey(0)  # constructed per spec; unused (no tensor inputs)

    # 1) Spec-sized test (d_model=32, seq=8) -> lane-dense flat path (W=256).
    d_model, max_seq = 32, 8
    pe = jax.block_until_ready(positional_encoding(d_model, max_seq))
    ref = _reference_pe(d_model, max_seq)
    assert pe.shape == (max_seq, d_model) and pe.dtype == jnp.float32
    assert jnp.allclose(pe, ref, atol=1e-5, rtol=1e-5)

    # 2) Lane-aligned d_model, multi-step grid -> row-tiled path.
    pe2 = jax.block_until_ready(positional_encoding(128, 64))
    assert jnp.allclose(pe2, _reference_pe(128, 64), atol=1e-5, rtol=1e-5)

    # 3) Even but not lane-friendly d_model -> row-tiled Path C (partial last block).
    pe3 = jax.block_until_ready(positional_encoding(96, 40))
    assert jnp.allclose(pe3, _reference_pe(96, 40), atol=1e-5, rtol=1e-5)

    # 4) Cached builder: second call is free (no kernel launch).
    a = positional_encoding_cached(d_model, max_seq)
    b = positional_encoding_cached(d_model, max_seq)
    assert a is b and jnp.allclose(a, ref, atol=1e-5, rtol=1e-5)

    print("KERNEL_OK")
</pallas_src>

<mosaic_0001>
module attributes {stable_mosaic.version = 11 : i64} {
  func.func @_pe_kernel(%arg0: i32, %arg1: memref<2x256xf32, #tpu.memory_space<vmem>>, %arg2: memref<1x256xf32, #tpu.memory_space<vmem>>) attributes {dimension_semantics = [#tpu.dimension_semantics<parallel>], iteration_bounds = array<i64: 1>, scalar_prefetch = 0 : i64, scratch_operands = 0 : i64, tpu.core_type = #tpu.core_type<tc>, window_params = [{pipeline_mode = #tpu.pipeline_mode<synchronous>, transform_indices = @transform_0, window_bounds = array<i64: 2, 256>}, {transform_indices = @transform_1, window_bounds = array<i64: 1, 256>}]} {
    %c1_i32 = arith.constant 1 : i32
    %0 = arith.muli %arg0, %c1_i32 : i32
    %1 = tpu.iota {dimensions = array<i32: 0>} : vector<1x1xi32>
    %2 = vector.broadcast %0 : i32 to vector<1x1xi32>
    %3 = arith.addi %2, %1 : vector<1x1xi32>
    %4 = arith.sitofp %3 : vector<1x1xi32> to vector<1x1xf32>
    %c0 = arith.constant 0 : index
    %c0_0 = arith.constant 0 : index
    %5 = vector.load %arg1[%c0, %c0_0] : memref<2x256xf32, #tpu.memory_space<vmem>>, vector<1x256xf32>
    %c1 = arith.constant 1 : index
    %c0_1 = arith.constant 0 : index
    %6 = vector.load %arg1[%c1, %c0_1] : memref<2x256xf32, #tpu.memory_space<vmem>>, vector<1x256xf32>
    %7 = vector.broadcast %4 : vector<1x1xf32> to vector<1x256xf32>
    %8 = arith.mulf %7, %5 : vector<1x256xf32>
    %9 = arith.addf %8, %6 : vector<1x256xf32>
    %10 = math.sin %9 : vector<1x256xf32>
    %c0_2 = arith.constant 0 : index
    %c0_3 = arith.constant 0 : index
    %11 = vector.load %arg2[%c0_2, %c0_3] : memref<1x256xf32, #tpu.memory_space<vmem>>, vector<1x256xf32>
    tpu.vector_store %arg2[%c0_2, %c0_3], %10 {strides = array<i32>} : memref<1x256xf32, #tpu.memory_space<vmem>>, vector<1x256xf32>,
    return
  }
  func.func @transform_0(%arg0: i32) -> (i32, i32) {
    %c0_i32 = arith.constant 0 : i32
    %c0_i32_0 = arith.constant 0 : i32
    %c0_i32_1 = arith.constant 0 : i32
    return %c0_i32, %c0_i32_0 : i32, i32
  }
  func.func @transform_1(%arg0: i32) -> (i32, i32) {
    %c0_i32 = arith.constant 0 : i32
    %c0_i32_0 = arith.constant 0 : i32
    return %arg0, %c0_i32 : i32, i32
  }
}

</mosaic_0001>

<bundles_post_ra>
// kernel: tpu_custom_call.1
= control target key start
LH: loop header
LB: loop body
LE: loop exit
PB: predicated region body
PF: predicated region fallthrough
CT: control target
= control target key end

     0   :  { %6 = vsyncpa [#allocation3], 0  ;;  %s649_s0 = inlined_call_operand.hbm [shape: f32[2,256], index: 0, kind: input, shape index: {}]   ;;  %s650_s1 = inlined_call_operand.hbm [shape: f32[1,256], index: 1, kind: output, shape index: {}]  }
   0x1   :  { %7 = vsyncpa [#allocation4], 0  ;;  %s13_s8 = sshll.u32 %s649_s0, 4  ;;  %s450_s9 = smov [#allocation2]   ;;  %s14_s8 = int_to_ptr.hbm [resolvable:$true] %s13_s8 }
   0x2   :  { %s15_s10 = sshll.u32 %s450_s9, 4  ;;  %s16_s10 = int_to_ptr.vmem [resolvable:$true] %s15_s10 }
   0x3   :  { %18 = dma.hbm_to_vmem [thread:$0]  %s14_s8, 64, %s16_s10, [#allocation3]  }
   0x4   :  { %446 = dma.done.wait [#allocation3], 64  }
   0x5   :  { %447 = vsyncadd [#allocation3], 4294967232  ;;  %v23_v0 = vlaneseq  ;;  %v28_v3 = vld [vmem:[#allocation2] ss:$2 sm:$0x3]  ;;  %s458_s0 = smov [#allocation5]  }
   0x6   :  { %v30_v4 = vld [vmem:[#allocation2 + $0x1] ss:$2 sm:$0x3]  ;;  %v32_v5 = vperm.slane %v28_v3, 0  ;;  %v33_v6 = vperm.slane %v28_v3, 1  ;;  %s371_s11 = sshll.u32 %s458_s0, 4  ;;  %s372_s11 = int_to_ptr.vmem [resolvable:$true] %s371_s11 }
   0x7   :  { %v24_v1 = vshrl.u32 %v23_v0, 7  ;;  %v39_v7 = vperm.slane %v30_v4, 0  ;;  %v40_v8 = vperm.slane %v30_v4, 1  ;;  %v451_v34 = vmov 683565275   ;;  %s373_s14 = sshll.u32 %s650_s1, 4  ;;  %s374_s14 = int_to_ptr.hbm [resolvable:$true] %s373_s14 }
   0x8   :  { %v452_v36 = vmov 2475754826   ;;  %v453_v38 = vmov 2131351028   ;;  %v454_v40 = vmov 2102212464  }
   0x9   :  { %v27_v2 = vcvt.s32.f32 %v24_v1  ;;  %v455_v42 = vmov 920167782   ;;  %v456_v51 = vmov 1326507024  }
   0xb   :  { %v36_v9 = vmul.f32 %v32_v5, %v27_v2  ;;  %v37_v10 = vmul.f32 %v33_v6, %v27_v2 }
   0xd   :  { %v473_v11 = vadd.f32 %v39_v7, %v36_v9  ;;  %v475_v12 = vadd.f32 %v40_v8, %v37_v10 }
   0xf   :  { %v45_v13 = vand.u32 2147483647, %v473_v11  ;;  %v48_v14 = vand.u32 2139095040, %v473_v11  ;;  %v200_v15 = vand.u32 2147483647, %v475_v12  ;;  %v203_v16 = vand.u32 2139095040, %v475_v12 }
  0x11   :  { %v49_v17 = vshrl.u32 %v48_v14, 23  ;;  %v52_v18 = vand.u32 8388607, %v45_v13  ;;  %v204_v19 = vshrl.u32 %v203_v16, 23  ;;  %v207_v23 = vand.u32 8388607, %v200_v15 }
  0x13   :  { %v383_v20 = vadd.s32 4294967169, %v49_v17  ;;  %v53_v21 = vor.u32 8388608, %v52_v18  ;;  %v386_v22 = vadd.s32 4294967169, %v204_v19  ;;  %v208_v28 = vor.u32 8388608, %v207_v23 }
  0x15   :  { %v55_v24 = vadd.s32 1, %v383_v20  ;;  %v210_v25 = vadd.s32 1, %v386_v22  ;;  %v485_v27 = vshll.u32 %v53_v21, 8  ;;  %v495_v45 = vshll.u32 %v208_v28, 8 }
  0x17   :  { %vm56_vm0 = vcmp.gt.s32.totalorder %v55_v24, 0  ;;  %vm211_vm1 = vcmp.gt.s32.totalorder %v210_v25, 0  ;;  %v94_v44 = vand.u32 65535, %v485_v27  ;;  %v95_v49 = vshrl.u32 %v485_v27, 16 }
  0x18   :  { %v57_v26 = vsel %vm56_vm0, %v55_v24, 0  ;;  %v212_v30 = vsel %vm211_vm1, %v210_v25, 0 }
  0x19   :  { %v59_v29 = vand.u32 31, %v57_v26  ;;  %v487_v31 = vshrl.u32 %v57_v26, 5  ;;  %v489_v32 = vand.u32 31, %v212_v30  ;;  %v513_v62 = vshrl.u32 %v212_v30, 5 }
  0x1b   :  { %v60_v33 = vsub.s32 32, %v59_v29  ;;  %v62_v35 = vshll.u32 %v451_v34, %v59_v29  ;;  %v65_v37 = vshll.u32 %v452_v36, %v59_v29  ;;  %v68_v39 = vshll.u32 %v453_v38, %v59_v29 }
  0x1c   :  { %v71_v41 = vshll.u32 %v454_v40, %v59_v29  ;;  %v74_v43 = vshll.u32 %v455_v42, %v59_v29  ;;  %vm77_vm2 = vcmp.lt.s32.totalorder %v487_v31, 1  ;;  %vm80_vm3 = vcmp.lt.s32.totalorder %v487_v31, 4 }
  0x1d   :  { %v63_v46 = vshrl.u32 %v452_v36, %v60_v33  ;;  %v66_v47 = vshrl.u32 %v453_v38, %v60_v33  ;;  %v69_v48 = vshrl.u32 %v454_v40, %v60_v33  ;;  %v72_v50 = vshrl.u32 %v455_v42, %v60_v33 }
  0x1e   :  { %v75_v52 = vshrl.u32 %v456_v51, %v60_v33  ;;  %v504_v56 = vsub.s32 32, %v489_v32  ;;  %v61_v57 = vshrl.u32 %v451_v34, %v60_v33  ;;  %vm79_vm4 = vcmp.lt.s32.totalorder %v487_v31, 3 }
  0x1f   :  { %v64_v53 = vor.u32 %v63_v46, %v62_v35  ;;  %v67_v54 = vor.u32 %v66_v47, %v65_v37  ;;  %v70_v55 = vor.u32 %v69_v48, %v68_v39  ;;  %v73_v58 = vor.u32 %v72_v50, %v71_v41 }
  0x20   :  { %v76_v59 = vor.u32 %v75_v52, %v74_v43  ;;  %vm78_vm5 = vcmp.lt.s32.totalorder %v487_v31, 2  ;;  %v217_v2 = vshll.u32 %v451_v34, %v489_v32  ;;  %v220_v3 = vshll.u32 %v452_v36, %v489_v32 }
  0x21   :  { %v85_v60 = vsel %vm77_vm2, %v64_v53, %v67_v54  ;;  %v89_v61 = vsel %vm77_vm2, %v67_v54, %v70_v55  ;;  %v86_v63 = vsel %vm80_vm3, %v73_v58, 920167782  ;;  %v82_v4 = vsel %vm80_vm3, %v70_v55, 2102212464 }
  0x22   :  { %v90_v1 = vsel %vm80_vm3, %v76_v59, 1326507024  ;;  %v87_v5 = vsel %vm79_vm4, %v70_v55, %v86_v63  ;;  %v218_v7 = vshrl.u32 %v452_v36, %v504_v56  ;;  %v81_v8 = vsel %vm77_vm2, %v61_v57, %v64_v53 }
  0x23   :  { %v91_v6 = vsel %vm79_vm4, %v73_v58, %v90_v1  ;;  %v88_v9 = vsel %vm78_vm5, %v85_v60, %v87_v5  ;;  %v221_v14 = vshrl.u32 %v453_v38, %v504_v56  ;;  %v83_v20 = vsel %vm79_vm4, %v67_v54, %v82_v4 }
  0x24   :  { %v92_v10 = vsel %vm78_vm5, %v89_v61, %v91_v6  ;;  %v118_v18 = vand.u32 65535, %v88_v9  ;;  %v119_v19 = vshrl.u32 %v88_v9, 16  ;;  %v538_v21 = vor.u32 %v218_v7, %v217_v2 }
  0x25   :  { %v96_v16 = vand.u32 65535, %v92_v10  ;;  %v97_v17 = vshrl.u32 %v92_v10, 16  ;;  %v540_v22 = vor.u32 %v221_v14, %v220_v3  ;;  %v223_v23 = vshll.u32 %v453_v38, %v489_v32 }
  0x26   :  { %v224_v28 = vshrl.u32 %v454_v40, %v504_v56  ;;  %v120_v30 = vmul.u32 %v118_v18, %v94_v44  ;;  %v121_v33 = vmul.u32 %v119_v19, %v94_v44  ;;  %v122_v35 = vmul.u32 %v118_v18, %v95_v49 }
  0x27   :  { %v98_v24 = vmul.u32 %v96_v16, %v94_v44  ;;  %v99_v25 = vmul.u32 %v97_v17, %v94_v44  ;;  %v100_v26 = vmul.u32 %v96_v16, %v95_v49  ;;  %v101_v29 = vmul.u32 %v97_v17, %v95_v49 }
  0x28   :  { %v123_v41 = vmul.u32 %v119_v19, %v95_v49  ;;  %v124_v46 = vshll.u32 %v121_v33, 16  ;;  %v125_v47 = vshrl.u32 %v121_v33, 16  ;;  %v126_v48 = vshll.u32 %v122_v35, 16 }
  0x29   :  { %v102_v36 = vshll.u32 %v99_v25, 16  ;;  %v103_v37 = vshrl.u32 %v99_v25, 16  ;;  %v104_v39 = vshll.u32 %v100_v26, 16  ;;  %v105_v43 = vshrl.u32 %v100_v26, 16 }
  0x2a   :  { %v127_v50 = vshrl.u32 %v122_v35, 16  ;;  %v226_v52 = vshll.u32 %v454_v40, %v489_v32  ;;  %v457_v53 = vmov 0   ;;  %vm128_vm7 = vc.u32 %v120_v30, %v124_v46 }
  0x2b   :  { %vm106_vm6 = vc.u32 %v98_v24, %v102_v36  ;;  %v108_v38 = vadd.s32 %v102_v36, %v98_v24  ;;  %v130_v44 = vadd.s32 %v124_v46, %v120_v30  ;;  %v227_v55 = vshrl.u32 %v455_v42, %v504_v56 }
  0x2c   :  { %v107_v54 = vsel %vm106_vm6, 1, %v457_v53  ;;  %v129_v49 = vsel %vm128_vm7, 1, %v457_v53  ;;  %v229_v58 = vshll.u32 %v455_v42, %v489_v32  ;;  %v225_v40 = vor.u32 %v224_v28, %v223_v23 }
  0x2d   :  { %v109_v57 = vadd.s32 %v107_v54, %v101_v29  ;;  %vm110_vm8 = vc.u32 %v108_v38, %v104_v39  ;;  %v131_v60 = vadd.s32 %v129_v49, %v123_v41  ;;  %vm132_vm9 = vc.u32 %v130_v44, %v126_v48 }
  0x2e   :  { %v111_v59 = vsel %vm110_vm8, 1, %v457_v53  ;;  %v133_v63 = vsel %vm132_vm9, 1, %v457_v53  ;;  %v228_v1 = vor.u32 %v227_v55, %v226_v52  ;;  %v230_v2 = vshrl.u32 %v456_v51, %v504_v56 }
  0x2f   :  { %v113_v61 = vadd.s32 %v111_v59, %v109_v57  ;;  %v557_v3 = vadd.s32 %v130_v44, %v126_v48  ;;  %v135_v4 = vadd.s32 %v133_v63, %v131_v60  ;;  %vm232_vm10 = vcmp.lt.s32.totalorder %v513_v62, 1 }
  0x30   :  { %vm234_vm11 = vcmp.lt.s32.totalorder %v513_v62, 3  ;;  %v231_v42 = vor.u32 %v230_v2, %v229_v58  ;;  %vm233_vm12 = vcmp.lt.s32.totalorder %v513_v62, 2  ;;  %vm235_vm13 = vcmp.lt.s32.totalorder %v513_v62, 4 }
  0x31   :  { %v114_v32 = vadd.s32 %v113_v61, %v103_v37  ;;  %v84_v5 = vsel %vm78_vm5, %v81_v8, %v83_v20  ;;  %v136_v6 = vadd.s32 %v135_v4, %v125_v47  ;;  %v240_v51 = vsel %vm232_vm10, %v538_v21, %v540_v22 }
  0x32   :  { %v241_v7 = vsel %vm235_vm13, %v228_v1, 920167782  ;;  %v244_v14 = vsel %vm232_vm10, %v540_v22, %v225_v40  ;;  %v249_v31 = vand.u32 65535, %v495_v45  ;;  %v245_v17 = vsel %vm235_vm13, %v231_v42, 1326507024 }
  0x33   :  { %v571_v9 = vadd.s32 %v114_v32, %v105_v43  ;;  %v242_v10 = vsel %vm234_vm11, %v225_v40, %v241_v7  ;;  %v137_v8 = vadd.s32 %v136_v6, %v127_v50  ;;  %v250_v18 = vshrl.u32 %v495_v45, 16 }
  0x34   :  { %v243_v16 = vsel %vm233_vm12, %v240_v51, %v242_v10  ;;  %v138_v19 = vmul.u32 %v485_v27, %v84_v5  ;;  %v246_v20 = vsel %vm234_vm11, %v228_v1, %v245_v17  ;;  %v216_v43 = vshrl.u32 %v451_v34, %v504_v56 }
  0x35   :  { %vm140_vm14 = vc.u32 %v571_v9, %v557_v3  ;;  %v273_v23 = vand.u32 65535, %v243_v16  ;;  %v141_v24 = vadd.s32 1, %v137_v8  ;;  %v247_v25 = vsel %vm233_vm12, %v244_v14, %v246_v20 }
  0x36   :  { %v274_v26 = vshrl.u32 %v243_v16, 16  ;;  %v251_v28 = vand.u32 65535, %v247_v25  ;;  %v252_v29 = vshrl.u32 %v247_v25, 16  ;;  %v237_v54 = vsel %vm235_vm13, %v225_v40, 2102212464 }
  0x37   :  { %v142_v30 = vsel %vm140_vm14, %v141_v24, %v137_v8  ;;  %v275_v33 = vmul.u32 %v273_v23, %v249_v31  ;;  %v277_v36 = vmul.u32 %v273_v23, %v250_v18  ;;  %v236_v34 = vsel %vm232_vm10, %v216_v43, %v538_v21 }
  0x38   :  { %v276_v35 = vmul.u32 %v274_v26, %v249_v31  ;;  %v143_v37 = vadd.s32 %v142_v30, %v138_v19  ;;  %v253_v27 = vmul.u32 %v251_v28, %v249_v31  ;;  %v254_v39 = vmul.u32 %v252_v29, %v249_v31 }
  0x39   :  { %v255_v41 = vmul.u32 %v251_v28, %v250_v18  ;;  %v278_v46 = vmul.u32 %v274_v26, %v250_v18  ;;  %v256_v38 = vmul.u32 %v252_v29, %v250_v18  ;;  %v281_v44 = vshll.u32 %v277_v36, 16 }
  0x3a   :  { %v279_v47 = vshll.u32 %v276_v35, 16  ;;  %v144_v48 = vadd.s32 536870912, %v143_v37  ;;  %v257_v50 = vshll.u32 %v254_v39, 16  ;;  %v258_v61 = vshrl.u32 %v254_v39, 16 }
  0x3b   :  { %v259_v52 = vshll.u32 %v255_v41, 16  ;;  %v238_v63 = vsel %vm234_vm11, %v540_v22, %v237_v54  ;;  %v280_v2 = vshrl.u32 %v276_v35, 16  ;;  %v260_v32 = vshrl.u32 %v255_v41, 16 }
  0x3c   :  { %vm283_vm15 = vc.u32 %v275_v33, %v279_v47  ;;  %v595_v55 = vshrl.u32 %v144_v48, 30  ;;  %vm261_vm0 = vc.u32 %v253_v27, %v257_v50  ;;  %v263_v57 = vadd.s32 %v257_v50, %v253_v27 }
  0x3d   :  { %v284_v49 = vsel %vm283_vm15, 1, %v457_v53  ;;  %v262_v56 = vsel %vm261_vm0, 1, %v457_v53  ;;  %v285_v58 = vadd.s32 %v279_v47, %v275_v33  ;;  %v282_v5 = vshrl.u32 %v277_v36, 16 }
  0x3e   :  { %v286_v59 = vadd.s32 %v284_v49, %v278_v46  ;;  %v146_v60 = vshll.u32 %v595_v55, 30  ;;  %v264_v40 = vadd.s32 %v262_v56, %v256_v38  ;;  %vm265_vm1 = vc.u32 %v263_v57, %v259_v52 }
  0x3f   :  { %v266_v1 = vsel %vm265_vm1, 1, %v457_v53  ;;  %vm287_vm2 = vc.u32 %v285_v58, %v281_v44  ;;  %v289_v10 = vadd.s32 %v285_v58, %v281_v44  ;;  %v239_v14 = vsel %vm233_vm12, %v236_v34, %v238_v63 }
  0x40   :  { %v147_v4 = vsub.s32 %v143_v37, %v146_v60  ;;  %v268_v21 = vadd.s32 %v266_v1, %v264_v40  ;;  %v288_v42 = vsel %vm287_vm2, 1, %v457_v53  ;;  %v293_v18 = vmul.u32 %v495_v45, %v239_v14 }
  0x41   :  { %v290_v6 = vadd.s32 %v288_v42, %v286_v59  ;;  %v139_v53 = vadd.s32 %v557_v3, %v571_v9  ;;  %vm47_vm7 = vcmp.lt.s32.totalorder %v473_v11, 0  ;;  %vm616_vm8 = vcmp.le.f32.partialorder %v45_v13, 0.7853982 }
  0x42   :  { %vm148_vm3 = vcmp.lt.s32.totalorder %v147_v4, 0  ;;  %v149_v51 = vsub.s32 0, %v147_v4  ;;  %v269_v7 = vadd.s32 %v268_v21, %v258_v61  ;;  %vm202_vm10 = vcmp.lt.s32.totalorder %v475_v12, 0 }
  0x43   :  { %v291_v31 = vadd.s32 %v290_v6, %v280_v2  ;;  %vm629_vm11 = vcmp.le.f32.partialorder %v200_v15, 0.7853982  ;;  %vm188_vm2 = vweird.f32 %v473_v11 }
  0x44   :  { %v150_v22 = vsel %vm148_vm3, %v149_v51, %v147_v4  ;;  %v270_v8 = vadd.s32 %v269_v7, %v260_v32  ;;  %vm343_vm3 = vweird.f32 %v475_v12 }
  0x45   :  { %v151_v16 = vclz %v150_v22  ;;  %v292_v17 = vadd.s32 %v291_v31, %v282_v5  ;;  %v169_v5 = vsub.s32 4, %v595_v55 }
  0x46   :  { %vm295_vm4 = vc.u32 %v270_v8, %v289_v10  ;;  %v294_v57 = vadd.s32 %v289_v10, %v270_v8 }
  0x47   :  { %v384_v19 = vadd.s32 4294967294, %v151_v16  ;;  %v296_v20 = vadd.s32 1, %v292_v17  ;;  %v170_v22 = vsel %vm47_vm7, %v169_v5, %v595_v55 }
  0x49   :  { %vm385_vm5 = vcmp.lt.s32.totalorder %v384_v19, 0  ;;  %v297_v23 = vsel %vm295_vm4, %v296_v20, %v292_v17  ;;  %v172_v20 = vsel %vm616_vm8, 0, %v170_v22  ;;  %vm358_vm4 = vcmask 1040384  }
  0x4a   :  { %v154_v24 = vsel %vm385_vm5, 0, %v384_v19  ;;  %v298_v25 = vadd.s32 %v297_v23, %v293_v18  ;;  %v189_v55 = vadd.s32 3, %v172_v20  ;;  %vm363_vm5 = vcmp.lt.s32.totalorder %v23_v0, 256 }
  0x4b   :  { %v155_v26 = vsub.s32 32, %v154_v24  ;;  %v156_v62 = vshll.u32 %v147_v4, %v154_v24  ;;  %v159_v28 = vsub.s32 4294967266, %v154_v24 }
  0x4c   :  { %v299_v29 = vadd.s32 536870912, %v298_v25 }
  0x4d   :  { %v157_v30 = vshrl.u32 %v139_v53, %v155_v26  ;;  %v160_v33 = vadd.s32 127, %v159_v28 }
  0x4e   :  { %v300_v35 = vshrl.u32 %v299_v29, 30 }
  0x4f   :  { %v158_v36 = vor.u32 %v157_v30, %v156_v62  ;;  %v161_v37 = vshll.u32 %v160_v33, 23 }
  0x50   :  { %v301_v45 = vshll.u32 %v300_v35, 30  ;;  %v324_v10 = vsub.s32 4, %v300_v35 }
  0x51   :  { %v162_v27 = vor.u32 4788187, %v161_v37  ;;  %v165_v39 = vcvt.s32.f32 %v158_v36  ;;  %v190_v37 = vand.u32 3, %v189_v55 }
  0x52   :  { %v302_v41 = vsub.s32 %v298_v25, %v301_v45  ;;  %v325_v18 = vsel %vm202_vm10, %v324_v10, %v300_v35 }
  0x53   :  { %v163_v43 = vand.u32 2147483647, %v162_v27  ;;  %v327_v53 = vsel %vm629_vm11, 0, %v325_v18  ;;  %vm192_vm12 = vcmp.eq.s32.totalorder %v190_v37, 0  ;;  %vm195_vm13 = vcmp.eq.s32.totalorder %v190_v37, 2 }
  0x54   :  { %vm303_vm6 = vcmp.lt.s32.totalorder %v302_v41, 0  ;;  %v304_v3 = vsub.s32 0, %v302_v41  ;;  %v344_v29 = vadd.s32 3, %v327_v53  ;;  %vm191_vm14 = vcmp.lt.s32.totalorder %v190_v37, 2 }
  0x55   :  { %v166_v9 = vmul.f32 %v165_v39, %v163_v43 }
  0x56   :  { %v305_v46 = vsel %vm303_vm6, %v304_v3, %v302_v41  ;;  %v345_v39 = vand.u32 3, %v344_v29 }
  0x57   :  { %v167_v48 = vxor.u32 2147483648, %v166_v9  ;;  %v306_v38 = vclz %v305_v46 }
  0x58   :  { %vm350_vm15 = vcmp.eq.s32.totalorder %v345_v39, 2  ;;  %vm347_vm0 = vcmp.eq.s32.totalorder %v345_v39, 0  ;;  %vm346_vm1 = vcmp.lt.s32.totalorder %v345_v39, 2 }
  0x59   :  { %v168_v50 = vsel %vm47_vm7, %v167_v48, %v166_v9  ;;  %v387_v52 = vadd.s32 4294967294, %v306_v38 }
  0x5a   :  { %v171_v54 = vsel %vm616_vm8, %v473_v11, %v168_v50 }
  0x5b   :  { %v173_v44 = vmul.f32 %v171_v54, %v171_v54  ;;  %vm388_vm9 = vcmp.lt.s32.totalorder %v387_v52, 0 }
  0x5c   :  { %v309_v49 = vsel %vm388_vm9, 0, %v387_v52 }
  0x5d   :  { %v181_v34 = vmul.f32 -0.00019511016, %v173_v44  ;;  %v310_v56 = vsub.s32 32, %v309_v49  ;;  %v311_v13 = vshll.u32 %v302_v41, %v309_v49  ;;  %v314_v58 = vsub.s32 4294967266, %v309_v49 }
  0x5e   :  { %v174_v60 = vmul.f32 -0.001358992, %v173_v44 }
  0x5f   :  { %v312_v59 = vshrl.u32 %v294_v57, %v310_v56  ;;  %v182_v61 = vadd.f32 0.008332121, %v181_v34  ;;  %v315_v40 = vadd.s32 127, %v314_v58 }
  0x60   :  { %v175_v2 = vadd.f32 0.041655596, %v174_v60 }
  0x61   :  { %v313_v63 = vor.u32 %v312_v59, %v311_v13  ;;  %v316_v1 = vshll.u32 %v315_v40, 23  ;;  %v183_v4 = vmul.f32 %v182_v61, %v173_v44 }
  0x62   :  { %v176_v6 = vmul.f32 %v175_v2, %v173_v44 }
  0x63   :  { %v317_v32 = vor.u32 4788187, %v316_v1  ;;  %v320_v21 = vcvt.s32.f32 %v313_v63  ;;  %v184_v51 = vadd.f32 -0.16666654, %v183_v4 }
  0x64   :  { %v177_v8 = vadd.f32 -0.4999988, %v176_v6 }
  0x65   :  { %v318_v42 = vand.u32 2147483647, %v317_v32  ;;  %v185_v16 = vmul.f32 %v184_v51, %v173_v44 }
  0x66   :  { %v178_v23 = vmul.f32 %v177_v8, %v173_v44 }
  0x67   :  { %v321_v7 = vmul.f32 %v320_v21, %v318_v42  ;;  %v186_v24 = vadd.f32 1.0, %v185_v16 }
  0x68   :  { %v179_v30 = vadd.f32 1.0, %v178_v23 }
  0x69   :  { %v322_v31 = vxor.u32 2147483648, %v321_v7  ;;  %v187_v33 = vmul.f32 %v186_v24, %v171_v54 }
  0x6a   :  { %v196_v43 = vxor.u32 2147483648, %v179_v30 }
  0x6b   :  { %v323_v17 = vsel %vm202_vm10, %v322_v31, %v321_v7  ;;  %v193_v41 = vxor.u32 2147483648, %v187_v33 }
  0x6c   :  { %v326_v19 = vsel %vm629_vm11, %v475_v12, %v323_v17  ;;  %v197_v38 = vsel %vm195_vm13, %v196_v43, %v187_v33 }
  0x6d   :  { %v328_v15 = vmul.f32 %v326_v19, %v326_v19  ;;  %v194_v48 = vsel %vm192_vm12, %v179_v30, %v193_v41 }
  0x6e   :  { %v198_v57 = vsel %vm191_vm14, %v194_v48, %v197_v38 }
  0x6f   :  { %v329_v25 = vmul.f32 -0.001358992, %v328_v15  ;;  %v336_v26 = vmul.f32 -0.00019511016, %v328_v15  ;;  %v199_v56 = vsel %vm188_vm2, nan, %v198_v57 }
  0x71   :  { %v330_v62 = vadd.f32 0.041655596, %v329_v25  ;;  %v337_v28 = vadd.f32 0.008332121, %v336_v26 }
  0x73   :  { %v331_v35 = vmul.f32 %v330_v62, %v328_v15  ;;  %v338_v36 = vmul.f32 %v337_v28, %v328_v15 }
  0x75   :  { %v332_v45 = vadd.f32 -0.4999988, %v331_v35  ;;  %v339_v27 = vadd.f32 -0.16666654, %v338_v36 }
  0x77   :  { %v333_v3 = vmul.f32 %v332_v45, %v328_v15  ;;  %v340_v9 = vmul.f32 %v339_v27, %v328_v15 }
  0x79   :  { %v334_v46 = vadd.f32 1.0, %v333_v3  ;;  %v341_v47 = vadd.f32 1.0, %v340_v9 }
  0x7b   :  { %v342_v50 = vmul.f32 %v341_v47, %v326_v19  ;;  %v351_v52 = vxor.u32 2147483648, %v334_v46 }
  0x7d   :  { %v348_v54 = vxor.u32 2147483648, %v342_v50  ;;  %v352_v44 = vsel %vm350_vm15, %v351_v52, %v342_v50 }
  0x7f   :  { %v349_v49 = vsel %vm347_vm0, %v334_v46, %v348_v54 }
  0x80   :  { %v353_v34 = vsel %vm346_vm1, %v349_v49, %v352_v44 }
  0x81   :  { %v354_v13 = vsel %vm343_vm3, nan, %v353_v34 }
  0x82   :  { %v357_v58 = vrot.slane %v354_v13, 7 }
  0x84   :  { %v359_v11 = vsel %vm358_vm4, %v199_v56, %v357_v58 }
  0x85   :  { %365 = vst.msk [vmem:[#allocation5] sm:$0x3] %vm363_vm5, %v359_v11 }
  0x86   :  { %376 = dma.vmem_to_hbm [thread:$0]  %s372_s11, 32, %s374_s14, [#allocation4]  }
  0x87   :  { %448 = dma.done.wait [#allocation4], 32  }
  0x88   :  { %449 = vsyncadd [#allocation4], 4294967264 }
  0x89   :  { %381 = vsyncpa [#allocation3], 1 }
  0x8a   :  { %382 = vsyncpa [#allocation4], 1 }

</bundles_post_ra>
